<compile_context>
chip_gen: v7x
topology: tpu7x:2x2x1
jax: 0.10.0
libtpu: 0.0.40
codegen_flags: <defaults>
</compile_context>

<pallas_src>
import numpy as np
import jax
import jax.numpy as jnp
from jax.experimental import pallas as pl
from jax.experimental.pallas import tpu as pltpu

MAX_ATOMIC_NUM = 100


# --------------------------------------------------------------------------
# Pallas kernel: fused 3-head MLP chain (Linear -> ReLU -> ... -> Linear).
# Refs: x, (w0, b0, w1, b1, ..., wn, bn), out.
# --------------------------------------------------------------------------
def _fused_mlp_kernel(*refs):
    x_ref = refs[0]
    out_ref = refs[-1]
    wb = refs[1:-1]
    n_layers = len(wb) // 2
    h = x_ref[...]                                     # f32 throughout, no casts
    for i in range(n_layers):
        w = wb[2 * i][...]
        b = wb[2 * i + 1][...]
        h = jnp.dot(h, w, preferred_element_type=jnp.float32) + b
        if i < n_layers - 1:                           # ReLU on all but last layer
            h = jnp.maximum(h, 0.0)
    out_ref[...] = h


def fused_mlp_forward(x, params, out_width, max_row_tile=256):
    """Run the fused (3-head) MLP as a single pallas_call.

    Rows are padded to a multiple of 8 sublanes (and of the row tile); the
    packed output width is a multiple of 128 lanes for unmasked stores.
    """
    batch, in_dim = x.shape
    rows8 = ((batch + 7) // 8) * 8                     # sublane alignment
    tile = min(max_row_tile, rows8)                    # row tile (mult. of 8)
    rows = ((rows8 + tile - 1) // tile) * tile
    if rows != batch:
        x = jnp.pad(x, ((0, rows - batch), (0, 0)))

    args = [x]
    in_specs = [pl.BlockSpec((tile, in_dim), lambda i: (i, 0))]
    for w, b in params:
        args += [w, b]
        # Whole-array weight/bias blocks; same block index every grid step so
        # they are DMA'd once and stay resident.
        in_specs += [
            pl.BlockSpec(w.shape, lambda i: (0, 0)),
            pl.BlockSpec(b.shape, lambda i: (0, 0)),
        ]

    out = pl.pallas_call(
        _fused_mlp_kernel,
        out_shape=jax.ShapeDtypeStruct((rows, out_width), jnp.float32),
        grid=(rows // tile,),
        in_specs=in_specs,
        out_specs=pl.BlockSpec((tile, out_width), lambda i: (i, 0)),
        compiler_params=pltpu.CompilerParams(
            dimension_semantics=("parallel",)),
    )(*args)
    return out[:batch]


# --------------------------------------------------------------------------
# Deterministic parameter construction (mirrors build_mlp layer shapes and
# nn.Linear's default uniform(+-1/sqrt(fan_in)) init).
# --------------------------------------------------------------------------
def init_mlp_params(key, in_dim, hidden_dim, fc_num_layers, out_dim):
    dims = [in_dim] + [hidden_dim] * fc_num_layers + [out_dim]
    params = []
    for i in range(len(dims) - 1):
        key, kw, kb = jax.random.split(key, 3)
        bound = 1.0 / float(np.sqrt(dims[i]))
        w = jax.random.uniform(kw, (dims[i], dims[i + 1]), jnp.float32,
                               minval=-bound, maxval=bound)
        b = jax.random.uniform(kb, (1, dims[i + 1]), jnp.float32,
                               minval=-bound, maxval=bound)
        params.append((w, b))
    return params, key


def fuse_head_params(head_params, hidden, stds, means, out_width,
                     col_na, col_lat_raw, col_lat_scaled, col_comp):
    """Fuse the 3 heads into one MLP parameter chain (+ folded lattice scaler).

    Layer 0: concat along output axis.  Middle layers: block-diagonal.
    Final layer: lane-dense packed matrix with an extra scaled-lattice copy
    (W*stds, b*stds+means) so the kernel also emits the inverse_transform'ed
    lattice values directly.
    """
    n_heads = len(head_params)
    n_layers = len(head_params[0])

    fused = []
    # Layer 0: (latent, n_heads*hidden)
    w0 = jnp.concatenate([p[0][0] for p in head_params], axis=1)
    b0 = jnp.concatenate([p[0][1] for p in head_params], axis=1)
    fused.append((w0, b0))

    # Middle layers: block-diagonal (n_heads*hidden, n_heads*hidden)
    for li in range(1, n_layers - 1):
        w = jnp.zeros((n_heads * hidden, n_heads * hidden), jnp.float32)
        for h_idx, p in enumerate(head_params):
            w = w.at[h_idx * hidden:(h_idx + 1) * hidden,
                     h_idx * hidden:(h_idx + 1) * hidden].set(p[li][0])
        b = jnp.concatenate([p[li][1] for p in head_params], axis=1)
        fused.append((w, b))

    # Final layer, packed & lane-dense (multiple of 128 wide).
    na_w, na_b = head_params[0][-1]        # (hidden, max_atoms+1)
    lat_w, lat_b = head_params[1][-1]      # (hidden, 6)
    comp_w, comp_b = head_params[2][-1]    # (hidden, MAX_ATOMIC_NUM)
    na_dim = na_w.shape[1]

    wf = jnp.zeros((n_heads * hidden, out_width), jnp.float32)
    bf = jnp.zeros((1, out_width), jnp.float32)

    wf = wf.at[0:hidden, col_na:col_na + na_dim].set(na_w)
    bf = bf.at[:, col_na:col_na + na_dim].set(na_b)

    wf = wf.at[hidden:2 * hidden, col_lat_raw:col_lat_raw + 6].set(lat_w)
    bf = bf.at[:, col_lat_raw:col_lat_raw + 6].set(lat_b)

    wf = wf.at[hidden:2 * hidden,
               col_lat_scaled:col_lat_scaled + 6].set(lat_w * stds[None, :])
    bf = bf.at[:, col_lat_scaled:col_lat_scaled + 6].set(
        lat_b * stds[None, :] + means[None, :])

    wf = wf.at[2 * hidden:3 * hidden,
               col_comp:col_comp + MAX_ATOMIC_NUM].set(comp_w)
    bf = bf.at[:, col_comp:col_comp + MAX_ATOMIC_NUM].set(comp_b)

    fused.append((wf, bf))
    return fused


class MLPDecodeStatsPallas:
    def __init__(self, hidden_dim, latent_dim, fc_num_layers, max_atoms,
                 lattice_scale_method=None, teacher_forcing_lattice=False,
                 key=None):
        self.lattice_scale_method = lattice_scale_method
        self.teacher_forcing_lattice = teacher_forcing_lattice
        self.max_atoms = max_atoms
        if key is None:
            key = jax.random.PRNGKey(0)

        # Per-head parameters (kept for reference / introspection).
        self.num_atoms_params, key = init_mlp_params(
            key, latent_dim, hidden_dim, fc_num_layers, max_atoms + 1)
        self.lattice_params, key = init_mlp_params(
            key, latent_dim, hidden_dim, fc_num_layers, 6)
        self.composition_params, key = init_mlp_params(
            key, latent_dim, hidden_dim, fc_num_layers, MAX_ATOMIC_NUM)

        # Deterministic stand-in for the externally-set StandardScaler
        # (lattice_scaler.inverse_transform(x) == x * stds + means).
        self.lattice_means = jnp.array([5., 5., 5., 90., 90., 90.], jnp.float32)
        self.lattice_stds = jnp.array([1., 1., 1., 10., 10., 10.], jnp.float32)

        # Packed-output column layout: [na | lat_raw | lat_scaled | comp | pad]
        na_dim = max_atoms + 1
        self.col_na = 0
        self.col_lat_raw = na_dim
        self.col_lat_scaled = na_dim + 6
        self.col_comp = na_dim + 12
        used = na_dim + 12 + MAX_ATOMIC_NUM
        self.out_width = ((used + 127) // 128) * 128   # lane-dense

        self.fused_params = fuse_head_params(
            [self.num_atoms_params, self.lattice_params,
             self.composition_params],
            hidden_dim, self.lattice_stds, self.lattice_means,
            self.out_width, self.col_na, self.col_lat_raw,
            self.col_lat_scaled, self.col_comp)

    # ---- single fused kernel launch covering all three heads ----
    def _run_fused(self, z):
        packed = fused_mlp_forward(z, self.fused_params, self.out_width)
        na_logits = packed[:, self.col_na:self.col_na + self.max_atoms + 1]
        laa_raw = packed[:, self.col_lat_raw:self.col_lat_raw + 6]
        laa_scaled = packed[:, self.col_lat_scaled:self.col_lat_scaled + 6]
        comp_rows = packed[:, self.col_comp:self.col_comp + MAX_ATOMIC_NUM]
        return na_logits, laa_raw, laa_scaled, comp_rows

    # ---- API-compatible sub-predictors (each still a single launch) ----
    def predict_num_atoms(self, z):
        return self._run_fused(z)[0]

    def predict_lattice(self, z, num_atoms):
        _, laa_raw, laa_scaled, _ = self._run_fused(z)
        lengths = laa_scaled[:, :3]
        angles = laa_scaled[:, 3:]
        if self.lattice_scale_method == "scale_length":
            lengths = lengths * (
                num_atoms.reshape(-1, 1).astype(jnp.float32) ** (1.0 / 3.0))
        return laa_raw, lengths, angles

    def predict_composition(self, z, num_atoms):
        comp_rows = self._run_fused(z)[3]
        # MLP is row-wise: repeat the small OUTPUT, not the input.
        # TODO(synk): int(np.asarray(...)) concretizes num_atoms; pass a static
        # total_repeat_length when running under jax.jit.
        total = int(np.asarray(num_atoms).sum())
        return jnp.repeat(comp_rows, num_atoms, axis=0,
                          total_repeat_length=total)

    def forward(self, z, gt_num_atoms=None, gt_lengths=None, gt_angles=None,
                teacher_forcing=False):
        # ONE kernel launch for all three heads.
        na_logits, laa_raw, laa_scaled, comp_rows = self._run_fused(z)
        lengths = laa_scaled[:, :3]
        angles = laa_scaled[:, 3:]

        if gt_num_atoms is not None:
            num_atoms_out = na_logits
            atoms = gt_num_atoms
        else:
            num_atoms_out = jnp.argmax(na_logits, axis=-1)
            atoms = num_atoms_out

        if self.lattice_scale_method == "scale_length":
            lengths = lengths * (
                atoms.reshape(-1, 1).astype(jnp.float32) ** (1.0 / 3.0))

        if (gt_num_atoms is not None and self.teacher_forcing_lattice
                and teacher_forcing):
            lengths = gt_lengths
            angles = gt_angles

        # Per-atom composition via output repeat (row-wise MLP identity).
        # TODO(synk): not jit-safe when `atoms` is traced; needs static total.
        total = int(np.asarray(atoms).sum())
        composition_per_atom = jnp.repeat(comp_rows, atoms, axis=0,
                                          total_repeat_length=total)

        return (num_atoms_out, laa_raw, lengths, angles, composition_per_atom)


# --------------------------------------------------------------------------
# Pure-numpy reference of the unfused module (validates the head fusion,
# block-diagonal middle layers, scaler fold and lane packing).
# --------------------------------------------------------------------------
def _np_mlp(x, params):
    h = np.asarray(x, np.float32)
    ps = [(np.asarray(w), np.asarray(b)) for w, b in params]
    for i, (w, b) in enumerate(ps):
        h = h @ w + b
        if i < len(ps) - 1:
            h = np.maximum(h, 0.0)
    return h


if __name__ == "__main__":
    # Small shapes consistent with the module's forward.
    batch = 2
    latent_dim = 32
    hidden_dim = 32
    fc_num_layers = 2
    max_atoms = 20

    key = jax.random.PRNGKey(0)
    kz, kparams = jax.random.split(key)
    z = jax.random.normal(kz, (batch, latent_dim), dtype=jnp.float32)
    gt_num_atoms = jnp.array([3, 5], dtype=jnp.int32)

    model = MLPDecodeStatsPallas(
        hidden_dim=hidden_dim,
        latent_dim=latent_dim,
        fc_num_layers=fc_num_layers,
        max_atoms=max_atoms,
        lattice_scale_method="scale_length",
        teacher_forcing_lattice=False,
        key=kparams,
    )

    # TODO(synk): dropout (drop_rate>0) is training-only noise and omitted.
    num_atoms, laa, lengths, angles, comp = model.forward(
        z, gt_num_atoms=gt_num_atoms)
    jax.block_until_ready((num_atoms, laa, lengths, angles, comp))

    # Also exercise the inference (argmax) path once.
    inf_out = model.forward(z)
    jax.block_until_ready(inf_out)

    total_atoms = int(np.asarray(gt_num_atoms).sum())
    assert num_atoms.shape == (batch, max_atoms + 1)
    assert laa.shape == (batch, 6)
    assert lengths.shape == (batch, 3)
    assert angles.shape == (batch, 3)
    assert comp.shape == (total_atoms, MAX_ATOMIC_NUM)
    assert inf_out[0].shape == (batch,)

    # Numerical check against the unfused numpy reference.
    z_np = np.asarray(z)
    gt_np = np.asarray(gt_num_atoms)
    ref_na = _np_mlp(z_np, model.num_atoms_params)
    ref_laa = _np_mlp(z_np, model.lattice_params)
    ref_scaled = (ref_laa * np.asarray(model.lattice_stds)
                  + np.asarray(model.lattice_means))
    ref_lengths = ref_scaled[:, :3] * (
        gt_np.astype(np.float32).reshape(-1, 1) ** (1.0 / 3.0))
    ref_angles = ref_scaled[:, 3:]
    ref_comp = np.repeat(_np_mlp(z_np, model.composition_params), gt_np, axis=0)

    np.testing.assert_allclose(np.asarray(num_atoms), ref_na,
                               rtol=5e-2, atol=5e-2)
    np.testing.assert_allclose(np.asarray(laa), ref_laa,
                               rtol=5e-2, atol=5e-2)
    np.testing.assert_allclose(np.asarray(lengths), ref_lengths,
                               rtol=5e-2, atol=5e-2)
    np.testing.assert_allclose(np.asarray(angles), ref_angles,
                               rtol=5e-2, atol=5e-2)
    np.testing.assert_allclose(np.asarray(comp), ref_comp,
                               rtol=5e-2, atol=5e-2)

    print("KERNEL_OK")
</pallas_src>

<mosaic_0001>
module attributes {stable_mosaic.version = 11 : i64} {
  func.func @_fused_mlp_kernel(%arg0: i32, %arg1: memref<8x32xf32, #tpu.memory_space<vmem>>, %arg2: memref<32x96xf32, #tpu.memory_space<vmem>>, %arg3: memref<1x96xf32, #tpu.memory_space<vmem>>, %arg4: memref<96x96xf32, #tpu.memory_space<vmem>>, %arg5: memref<1x96xf32, #tpu.memory_space<vmem>>, %arg6: memref<96x256xf32, #tpu.memory_space<vmem>>, %arg7: memref<1x256xf32, #tpu.memory_space<vmem>>, %arg8: memref<8x256xf32, #tpu.memory_space<vmem>>) attributes {dimension_semantics = [#tpu.dimension_semantics<parallel>], iteration_bounds = array<i64: 1>, scalar_prefetch = 0 : i64, scratch_operands = 0 : i64, tpu.core_type = #tpu.core_type<tc>, window_params = [{transform_indices = @transform_0, window_bounds = array<i64: 8, 32>}, {pipeline_mode = #tpu.pipeline_mode<synchronous>, transform_indices = @transform_1, window_bounds = array<i64: 32, 96>}, {pipeline_mode = #tpu.pipeline_mode<synchronous>, transform_indices = @transform_2, window_bounds = array<i64: 1, 96>}, {pipeline_mode = #tpu.pipeline_mode<synchronous>, transform_indices = @transform_3, window_bounds = array<i64: 96, 96>}, {pipeline_mode = #tpu.pipeline_mode<synchronous>, transform_indices = @transform_4, window_bounds = array<i64: 1, 96>}, {pipeline_mode = #tpu.pipeline_mode<synchronous>, transform_indices = @transform_5, window_bounds = array<i64: 96, 256>}, {pipeline_mode = #tpu.pipeline_mode<synchronous>, transform_indices = @transform_6, window_bounds = array<i64: 1, 256>}, {transform_indices = @transform_7, window_bounds = array<i64: 8, 256>}]} {
    %c0 = arith.constant 0 : index
    %c0_0 = arith.constant 0 : index
    %0 = vector.load %arg1[%c0, %c0_0] : memref<8x32xf32, #tpu.memory_space<vmem>>, vector<8x32xf32>
    %c0_1 = arith.constant 0 : index
    %c0_2 = arith.constant 0 : index
    %1 = vector.load %arg2[%c0_1, %c0_2] : memref<32x96xf32, #tpu.memory_space<vmem>>, vector<32x96xf32>
    %c0_3 = arith.constant 0 : index
    %c0_4 = arith.constant 0 : index
    %2 = vector.load %arg3[%c0_3, %c0_4] : memref<1x96xf32, #tpu.memory_space<vmem>>, vector<1x96xf32>
    %cst = arith.constant dense<0.000000e+00> : vector<8x96xf32>
    %3 = tpu.matmul %0, %1, %cst {dimension_numbers = #tpu.dot_dimension_numbers<[1], [0], [0], [1], [0, 0, 1, 1], [], []>} : vector<8x32xf32>, vector<32x96xf32>, vector<8x96xf32> -> vector<8x96xf32>
    %4 = vector.broadcast %2 : vector<1x96xf32> to vector<8x96xf32>
    %5 = arith.addf %3, %4 : vector<8x96xf32>
    %cst_5 = arith.constant 0.000000e+00 : f32
    %6 = vector.broadcast %cst_5 : f32 to vector<8x96xf32>
    %7 = arith.maximumf %5, %6 : vector<8x96xf32>
    %c0_6 = arith.constant 0 : index
    %c0_7 = arith.constant 0 : index
    %8 = vector.load %arg4[%c0_6, %c0_7] : memref<96x96xf32, #tpu.memory_space<vmem>>, vector<96x96xf32>
    %c0_8 = arith.constant 0 : index
    %c0_9 = arith.constant 0 : index
    %9 = vector.load %arg5[%c0_8, %c0_9] : memref<1x96xf32, #tpu.memory_space<vmem>>, vector<1x96xf32>
    %cst_10 = arith.constant dense<0.000000e+00> : vector<8x96xf32>
    %10 = tpu.matmul %7, %8, %cst_10 {dimension_numbers = #tpu.dot_dimension_numbers<[1], [0], [0], [1], [0, 0, 1, 1], [], []>} : vector<8x96xf32>, vector<96x96xf32>, vector<8x96xf32> -> vector<8x96xf32>
    %11 = vector.broadcast %9 : vector<1x96xf32> to vector<8x96xf32>
    %12 = arith.addf %10, %11 : vector<8x96xf32>
    %cst_11 = arith.constant 0.000000e+00 : f32
    %13 = vector.broadcast %cst_11 : f32 to vector<8x96xf32>
    %14 = arith.maximumf %12, %13 : vector<8x96xf32>
    %c0_12 = arith.constant 0 : index
    %c0_13 = arith.constant 0 : index
    %15 = vector.load %arg6[%c0_12, %c0_13] : memref<96x256xf32, #tpu.memory_space<vmem>>, vector<96x256xf32>
    %c0_14 = arith.constant 0 : index
    %c0_15 = arith.constant 0 : index
    %16 = vector.load %arg7[%c0_14, %c0_15] : memref<1x256xf32, #tpu.memory_space<vmem>>, vector<1x256xf32>
    %cst_16 = arith.constant dense<0.000000e+00> : vector<8x256xf32>
    %17 = tpu.matmul %14, %15, %cst_16 {dimension_numbers = #tpu.dot_dimension_numbers<[1], [0], [0], [1], [0, 0, 1, 1], [], []>} : vector<8x96xf32>, vector<96x256xf32>, vector<8x256xf32> -> vector<8x256xf32>
    %18 = vector.broadcast %16 : vector<1x256xf32> to vector<8x256xf32>
    %19 = arith.addf %17, %18 : vector<8x256xf32>
    %c0_17 = arith.constant 0 : index
    %c0_18 = arith.constant 0 : index
    %20 = vector.load %arg8[%c0_17, %c0_18] : memref<8x256xf32, #tpu.memory_space<vmem>>, vector<8x256xf32>
    tpu.vector_store %arg8[%c0_17, %c0_18], %19 {strides = array<i32>} : memref<8x256xf32, #tpu.memory_space<vmem>>, vector<8x256xf32>,
    return
  }
  func.func @transform_0(%arg0: i32) -> (i32, i32) {
    %c0_i32 = arith.constant 0 : i32
    %c0_i32_0 = arith.constant 0 : i32
    return %arg0, %c0_i32 : i32, i32
  }
  func.func @transform_1(%arg0: i32) -> (i32, i32) {
    %c0_i32 = arith.constant 0 : i32
    %c0_i32_0 = arith.constant 0 : i32
    %c0_i32_1 = arith.constant 0 : i32
    return %c0_i32, %c0_i32_0 : i32, i32
  }
  func.func @transform_2(%arg0: i32) -> (i32, i32) {
    %c0_i32 = arith.constant 0 : i32
    %c0_i32_0 = arith.constant 0 : i32
    %c0_i32_1 = arith.constant 0 : i32
    return %c0_i32, %c0_i32_0 : i32, i32
  }
  func.func @transform_3(%arg0: i32) -> (i32, i32) {
    %c0_i32 = arith.constant 0 : i32
    %c0_i32_0 = arith.constant 0 : i32
    %c0_i32_1 = arith.constant 0 : i32
    return %c0_i32, %c0_i32_0 : i32, i32
  }
  func.func @transform_4(%arg0: i32) -> (i32, i32) {
    %c0_i32 = arith.constant 0 : i32
    %c0_i32_0 = arith.constant 0 : i32
    %c0_i32_1 = arith.constant 0 : i32
    return %c0_i32, %c0_i32_0 : i32, i32
  }
  func.func @transform_5(%arg0: i32) -> (i32, i32) {
    %c0_i32 = arith.constant 0 : i32
    %c0_i32_0 = arith.constant 0 : i32
    %c0_i32_1 = arith.constant 0 : i32
    return %c0_i32, %c0_i32_0 : i32, i32
  }
  func.func @transform_6(%arg0: i32) -> (i32, i32) {
    %c0_i32 = arith.constant 0 : i32
    %c0_i32_0 = arith.constant 0 : i32
    %c0_i32_1 = arith.constant 0 : i32
    return %c0_i32, %c0_i32_0 : i32, i32
  }
  func.func @transform_7(%arg0: i32) -> (i32, i32) {
    %c0_i32 = arith.constant 0 : i32
    %c0_i32_0 = arith.constant 0 : i32
    return %arg0, %c0_i32 : i32, i32
  }
}

</mosaic_0001>

<bundles_post_ra>
// kernel: tpu_custom_call.1
= control target key start
LH: loop header
LB: loop body
LE: loop exit
PB: predicated region body
PF: predicated region fallthrough
CT: control target
= control target key end

     0   :  { %12 = vsyncpa [#allocation3], 0  ;;  %s758_s0 = inlined_call_operand.hbm [shape: f32[8,32], index: 0, kind: input, shape index: {}]   ;;  %s759_s1 = inlined_call_operand.hbm [shape: f32[32,96], index: 1, kind: input, shape index: {}]   ;;  %s760_s2 = inlined_call_operand.vmem [shape: f32[1,96], index: 2, kind: input, shape index: {}]   ;;  %s761_s3 = inlined_call_operand.hbm [shape: f32[96,96], index: 3, kind: input, shape index: {}]   ;;  %s762_s4 = inlined_call_operand.vmem [shape: f32[1,96], index: 4, kind: input, shape index: {}]   ;;  %s763_s5 = inlined_call_operand.hbm [shape: f32[96,256], index: 5, kind: input, shape index: {}]   ;;  %s764_s6 = inlined_call_operand.vmem [shape: f32[1,256], index: 6, kind: input, shape index: {}]   ;;  %s765_s7 = inlined_call_operand.hbm [shape: f32[8,256], index: 7, kind: output, shape index: {}]  }
   0x1   :  { %13 = vsyncpa [#allocation6], 0 }
   0x2   :  { %14 = vsyncpa [#allocation9], 0 }
   0x3   :  { %15 = vsyncpa [#allocation4], 0  ;;  %s629_s24 = smov [#allocation5]   ;;  %s511_s28 = scalar_lea.hbm %s759_s1, 512 }
   0x4   :  { %s31_s25 = sshll.u32 %s629_s24, 4  ;;  %p512_p0 = scmp.ne.s32.totalorder %s759_s1, %s511_s28  ;;  %s32_s25 = int_to_ptr.vmem [resolvable:$true] %s31_s25 }
   0x5   :  { %p515_p1 = scmp.lt.u32.totalorder %s511_s28, %s759_s1 }
   0x7   :  { %p517_p2 = pnand %p515_p1, %p512_p0 }
   0x9   :  { %520 = shalt.err (!%p517_p2)
}
   0xa   :  { %s521_s10 = scalar_lea.vmem %s32_s25, 512  ;;  %p526_p4 = scmp.lt.s32.totalorder %s32_s25, %s32_s25 }
   0xb   :  { %p522_p3 = scmp.ne.s32.totalorder %s32_s25, %s521_s10  ;;  %p527_p5 = scmp.lt.s32.totalorder %s521_s10, %s521_s10 }
   0xd   :  { %p528_p6 = por %p527_p5, %p526_p4 }
   0xf   :  { %p529_p7 = pnand %p528_p6, %p522_p3 }
  0x11   :  { %532 = shalt.err (!%p529_p7)
}
  0x12   :  { %s630_s11 = smov 128   ;;  %s631_s12 = smov 8  }
  0x13   :  { %37 = dma.hbm_to_vmem [thread:$0]  %s759_s1, 512, %s32_s25, [#allocation6], %s630_s11, %s630_s11, %s631_s12  }
  0x14   :  { %s632_s15 = smov [#allocation2]   ;;  %s633_s17 = smov [#allocation7]  }
  0x15   :  { %s22_s16 = sshll.u32 %s632_s15, 4  ;;  %s45_s18 = sshll.u32 %s633_s17, 4  ;;  %s23_s16 = int_to_ptr.vmem [resolvable:$true] %s22_s16  ;;  %s46_s18 = int_to_ptr.vmem [resolvable:$true] %s45_s18 }
  0x16   :  { %s533_s21 = scalar_lea.hbm %s758_s0, 128 }
  0x17   :  { %p534_p8 = scmp.ne.s32.totalorder %s758_s0, %s533_s21  ;;  %p537_p9 = scmp.lt.u32.totalorder %s533_s21, %s758_s0 }
  0x19   :  { %p539_p10 = pnand %p537_p9, %p534_p8 }
  0x1b   :  { %542 = shalt.err (!%p539_p10)
}
  0x1c   :  { %s543_s1 = scalar_lea.vmem %s23_s16, 128  ;;  %p548_p12 = scmp.lt.s32.totalorder %s23_s16, %s23_s16 }
  0x1d   :  { %p544_p11 = scmp.ne.s32.totalorder %s23_s16, %s543_s1  ;;  %p549_p13 = scmp.lt.s32.totalorder %s543_s1, %s543_s1 }
  0x1f   :  { %p550_p0 = por %p549_p13, %p548_p12 }
  0x21   :  { %p551_p1 = pnand %p550_p0, %p544_p11 }
  0x23   :  { %554 = shalt.err (!%p551_p1)
}
  0x24   :  { %25 = dma.hbm_to_vmem [thread:$0]  %s758_s0, 128, %s23_s16, [#allocation3]  }
  0x25   :  { %s555_s30 = scalar_lea.hbm %s761_s3, 1536 }
  0x26   :  { %p556_p2 = scmp.ne.s32.totalorder %s761_s3, %s555_s30  ;;  %p559_p3 = scmp.lt.u32.totalorder %s555_s30, %s761_s3 }
  0x28   :  { %p561_p4 = pnand %p559_p3, %p556_p2 }
  0x2a   :  { %564 = shalt.err (!%p561_p4)
}
  0x2b   :  { %s565_s14 = scalar_lea.vmem %s46_s18, 1536  ;;  %p570_p6 = scmp.lt.s32.totalorder %s46_s18, %s46_s18 }
  0x2c   :  { %p566_p5 = scmp.ne.s32.totalorder %s46_s18, %s565_s14  ;;  %p571_p7 = scmp.lt.s32.totalorder %s565_s14, %s565_s14 }
  0x2e   :  { %p572_p8 = por %p571_p7, %p570_p6 }
  0x30   :  { %p573_p9 = pnand %p572_p8, %p566_p5 }
  0x32   :  { %576 = shalt.err (!%p573_p9)
}
  0x33   :  { %51 = dma.hbm_to_vmem [thread:$0]  %s761_s3, 1536, %s46_s18, [#allocation6], %s630_s11, %s630_s11, %s631_s12  }
  0x34   :  { %s634_s16 = smov [#allocation8]   ;;  %s577_s21 = scalar_lea.hbm %s763_s5, 3072 }
  0x35   :  { %s59_s17 = sshll.u32 %s634_s16, 4  ;;  %p578_p10 = scmp.ne.s32.totalorder %s763_s5, %s577_s21  ;;  %s60_s17 = int_to_ptr.vmem [resolvable:$true] %s59_s17 }
  0x36   :  { %p581_p11 = scmp.lt.u32.totalorder %s577_s21, %s763_s5 }
  0x38   :  { %p583_p12 = pnand %p581_p11, %p578_p10 }
  0x3a   :  { %586 = shalt.err (!%p583_p12)
}
  0x3b   :  { %s587_s1 = scalar_lea.vmem %s60_s17, 3072  ;;  %p592_p0 = scmp.lt.s32.totalorder %s60_s17, %s60_s17 }
  0x3c   :  { %p588_p13 = scmp.ne.s32.totalorder %s60_s17, %s587_s1  ;;  %p593_p1 = scmp.lt.s32.totalorder %s587_s1, %s587_s1 }
  0x3e   :  { %p594_p2 = por %p593_p1, %p592_p0 }
  0x40   :  { %p595_p3 = pnand %p594_p2, %p588_p13 }
  0x42   :  { %598 = shalt.err (!%p595_p3)
}
  0x43   :  { %s635_s3 = smov 256   ;;  %s636_s11 = smov 16  }
  0x44   :  { %65 = dma.hbm_to_vmem [thread:$0]  %s763_s5, 3072, %s60_s17, [#allocation9], %s635_s3, %s635_s3, %s636_s11  }
  0x45   :  { %621 = dma.done.wait [#allocation3], 128  }
  0x46   :  { %622 = vsyncadd [#allocation3], 4294967168 }
  0x47   :  { %623 = dma.done.wait [#allocation6], 2048  }
  0x48   :  { %624 = vsyncadd [#allocation6], 4294965248 }
  0x49   :  { %625 = dma.done.wait [#allocation9], 3072  }
  0x4a   :  { %626 = vsyncadd [#allocation9], 4294964224  ;;  %v637_v0 = vmov 0.0|0.0   ;;  %vm638_vm0 = vmmov 0   ;;  %v639_v1 = vmov 0.0   ;;  %v81_v2 = vld [vmem:[#allocation5] sm:$0xff] }
  0x4b   :  { %451 = vmatprep.subr.bf16.mxu0 %v637_v0  ;;  %421 = vmatprep.mubr.msk.f32.mxu0 %vm638_vm0, %v639_v1  ;;  %v82_v3 = vld [vmem:[#allocation5 + $0x8] sm:$0xff]  ;;  %v83_v4 = vld [vmem:[#allocation5 + $0x10] sm:$0xff]  ;;  %v84_v6 = vld [vmem:[#allocation5 + $0x18] sm:$0xff]  ;;  %vm92_vm1 = vcmask 261120   ;;  %vm186_vm2 = vcmask 785408   ;;  %s640_s30 = smov [#allocation10]  }
  0x4c   :  { %457 = vmatprep.subr.bf16.mxu1 %v637_v0  ;;  %448 = vmatprep.mubr.msk.f32.mxu1 %vm638_vm0, %v639_v1  ;;  %v452_v5 = vpack.c.bf16 %v82_v3, %v81_v2  ;;  %v167_v7 = vld [vmem:[#allocation7] sm:$0xff]  ;;  %v168_v8 = vld [vmem:[#allocation7 + $0x8] sm:$0xff]  ;;  %v169_v9 = vld [vmem:[#allocation7 + $0x10] sm:$0xff]  ;;  %v455_v11 = vpack.c.bf16 %v84_v6, %v83_v4  ;;  %s379_s8 = sshll.u32 %s640_s30, 4  ;;  %s380_s8 = int_to_ptr.vmem [resolvable:$true] %s379_s8 }
  0x4d   :  { %v170_v10 = vld [vmem:[#allocation7 + $0x18] sm:$0xff]  ;;  %v458_v12 = vpack.c.bf16 %v168_v8, %v167_v7  ;;  %v171_v14 = vld [vmem:[#allocation7 + $0x20] sm:$0xff]  ;;  %v172_v15 = vld [vmem:[#allocation7 + $0x28] sm:$0xff]  ;;  %p604_p5 = scmp.lt.s32.totalorder %s380_s8, %s380_s8 }
  0x4e   :  { %453 = vmatpush3.bf16.msra.mxu0 %v452_v5  ;;  %v461_v13 = vpack.c.bf16 %v170_v10, %v169_v9  ;;  %v80_v16 = vld [vmem:[#allocation2] sm:$0xff]  ;;  %v464_v17 = vpack.c.bf16 %v172_v15, %v171_v14  ;;  %v173_v18 = vld [vmem:[#allocation7 + $0x30] sm:$0xff]  ;;  %v175_v21 = vld [vmem:[#allocation7 + $0x40] sm:$0xff]  ;;  %v287_v9 = vlaneseq }
  0x4f   :  { %454 = vmatprep.subr.bf16.mxu0 %v637_v0  ;;  %459 = vmatpush3.bf16.msra.mxu1 %v458_v12  ;;  %v174_v19 = vld [vmem:[#allocation7 + $0x38] sm:$0xff]  ;;  %v176_v22 = vld [vmem:[#allocation7 + $0x48] sm:$0xff]  ;;  %v177_v24 = vld [vmem:[#allocation7 + $0x50] sm:$0xff] }
  0x50   :  { %460 = vmatprep.subr.bf16.mxu1 %v637_v0  ;;  %v467_v20 = vpack.c.bf16 %v174_v19, %v173_v18  ;;  %v470_v23 = vpack.c.bf16 %v176_v22, %v175_v21  ;;  %v178_v25 = vld [vmem:[#allocation7 + $0x58] sm:$0xff]  ;;  %v262_v27 = vld [vmem:[#allocation8 + $0x8] sm:$0xff]  ;;  %v261_v29 = vld [vmem:[#allocation8] sm:$0xff]  ;;  %v288_v10 = vshrl.u32 %v287_v9, 7 }
  0x51   :  { %v473_v26 = vpack.c.bf16 %v178_v25, %v177_v24  ;;  %v264_v28 = vld [vmem:[#allocation8 + $0x18] sm:$0xff]  ;;  %v263_v31 = vld [vmem:[#allocation8 + $0x10] sm:$0xff]  ;;  %v266_v32 = vld [vmem:[#allocation8 + $0x28] sm:$0xff] }
  0x52   :  { %456 = vmatpush3.bf16.msra.mxu0 %v455_v11  ;;  %v475_v30 = vpack.c.bf16 %v264_v28, %v262_v27  ;;  %v268_v33 = vld [vmem:[#allocation8 + $0x38] sm:$0xff]  ;;  %v477_v34 = vpack.c.bf16 %v263_v31, %v261_v29  ;;  %v265_v36 = vld [vmem:[#allocation8 + $0x20] sm:$0xff]  ;;  %v267_v37 = vld [vmem:[#allocation8 + $0x30] sm:$0xff]  ;;  %v289_v11 = vsub.s32 0, %v288_v10 }
  0x53   :  { %462 = vmatpush3.bf16.msra.mxu1 %v461_v13  ;;  %v479_v35 = vpack.c.bf16 %v268_v33, %v266_v32  ;;  %v270_v38 = vld [vmem:[#allocation8 + $0x48] sm:$0xff]  ;;  %v272_v39 = vld [vmem:[#allocation8 + $0x58] sm:$0xff]  ;;  %v481_v40 = vpack.c.bf16 %v267_v37, %v265_v36  ;;  %v269_v42 = vld [vmem:[#allocation8 + $0x40] sm:$0xff]  ;;  %v293_v13 = vsub.s32 1, %v288_v10 }
  0x54   :  { %463 = vmatprep.subr.bf16.mxu1 %v637_v0  ;;  %476 = vmatprep.subr.bf16.mxu0 %v475_v30  ;;  %v483_v41 = vpack.c.bf16 %v272_v39, %v270_v38  ;;  %v271_v43 = vld [vmem:[#allocation8 + $0x50] sm:$0xff]  ;;  %v274_v44 = vld [vmem:[#allocation8 + $0x68] sm:$0xff]  ;;  %v276_v45 = vld [vmem:[#allocation8 + $0x78] sm:$0xff] }
  0x55   :  { %422 = vmatmul.mubr.msk.f32.vlgmr.msra.gmra.mrb[0].mxu0 %vm92_vm1, %v80_v16  ;;  %v485_v46 = vpack.c.bf16 %v271_v43, %v269_v42  ;;  %v487_v47 = vpack.c.bf16 %v276_v45, %v274_v44  ;;  %v273_v48 = vld [vmem:[#allocation8 + $0x60] sm:$0xff]  ;;  %v275_v49 = vld [vmem:[#allocation8 + $0x70] sm:$0xff]  ;;  %v278_v50 = vld [vmem:[#allocation8 + $0x88] sm:$0xff] }
  0x56   :  { %364 = vmatprep.mubr.f32.mxu0 %v639_v1  ;;  %478 = vmatpush1.bf16.msra.mxu0 %v477_v34  ;;  %v280_v51 = vld [vmem:[#allocation8 + $0x98] sm:$0xff]  ;;  %v489_v52 = vpack.c.bf16 %v275_v49, %v273_v48  ;;  %v277_v54 = vld [vmem:[#allocation8 + $0x80] sm:$0xff]  ;;  %v279_v55 = vld [vmem:[#allocation8 + $0x90] sm:$0xff] }
  0x57   :  { %465 = vmatpush3.bf16.msra.mxu1 %v464_v17  ;;  %480 = vmatprep.subr.bf16.mxu0 %v479_v35  ;;  %v491_v53 = vpack.c.bf16 %v280_v51, %v278_v50  ;;  %v493_v56 = vpack.c.bf16 %v279_v55, %v277_v54  ;;  %v390_v57 = vld [vmem:[%s760_s2] ss:$0 sm:$0xff]  ;;  %v282_v62 = vld [vmem:[#allocation8 + $0xa8] sm:$0xff]  ;;  %v281_v1 = vld [vmem:[#allocation8 + $0xa0] sm:$0xff] }
  0x58   :  { %466 = vmatprep.subr.bf16.mxu1 %v637_v0  ;;  %v284_v63 = vld [vmem:[#allocation8 + $0xb8] sm:$0xff]  ;;  %v283_v2 = vld [vmem:[#allocation8 + $0xb0] sm:$0xff] }
  0x59   :  { %v497_v3 = vpack.c.bf16 %v283_v2, %v281_v1  ;;  %v392_v4 = vld [vmem:[%s762_s4] ss:$0 sm:$0xff]  ;;  %s599_s4 = scalar_lea.vmem %s380_s8, 256 }
  0x5a   :  { %482 = vmatpush1.bf16.msra.mxu0 %v481_v40  ;;  %v285_v12 = vld [vmem:[%s764_s6] sm:$0x3]  ;;  %p600_p4 = scmp.ne.s32.totalorder %s380_s8, %s599_s4  ;;  %p605_p6 = scmp.lt.s32.totalorder %s599_s4, %s599_s4 }
  0x5b   :  { %468 = vmatpush3.bf16.msra.mxu1 %v467_v20  ;;  %484 = vmatprep.subr.bf16.mxu0 %v483_v41  ;;  %v290_v14 = vrot.slane %v285_v12, %v289_v11  ;;  %v294_v15 = vrot.slane %v285_v12, %v293_v13 }
  0x5c   :  { %469 = vmatprep.subr.bf16.mxu1 %v637_v0  ;;  %p606_p7 = por %p605_p6, %p604_p5 }
  0x5e   :  { %486 = vmatpush1.bf16.msra.mxu0 %v485_v46  ;;  %p607_p8 = pnand %p606_p7, %p600_p4 }
  0x5f   :  { %471 = vmatpush3.bf16.msra.mxu1 %v470_v23  ;;  %488 = vmatprep.subr.bf16.mxu0 %v487_v47 }
  0x60   :  { %472 = vmatprep.subr.bf16.mxu1 %v637_v0  ;;  %v495_v0 = vpack.c.bf16 %v284_v63, %v282_v62 }
  0x62   :  { %490 = vmatpush1.bf16.msra.mxu0 %v489_v52 }
  0x63   :  { %474 = vmatpush3.bf16.msra.mxu1 %v473_v26  ;;  %492 = vmatprep.subr.bf16.mxu0 %v491_v53 }
  0x66   :  { %494 = vmatpush1.bf16.msra.mxu0 %v493_v56 }
  0x67   :  { %496 = vmatprep.subr.bf16.mxu0 %v495_v0 }
  0x6a   :  { %498 = vmatpush1.bf16.msra.mxu0 %v497_v3 }
 0x128   :  { %v162_v58 = vpop.f32.mrb[0].mxu0 }
 0x129   :  { %v163_v59 = vadd.f32 %v390_v57, %v162_v58  ;;  %v423_v60 = vpop.f32.mrb[1].mxu0 }
 0x12b   :  { %v166_v61 = vmax.f32 %v163_v59, 0.0 }
 0x12d   :  { %449 = vmatmul.mubr.msk.f32.vlgmr.msra.gmra.mrb[0].mxu1 %vm186_vm2, %v166_v61 }
 0x200   :  { %v256_v5 = vpop.f32.mrb[0].mxu1 }
 0x201   :  { %v257_v6 = vadd.f32 %v392_v4, %v256_v5  ;;  %v450_v7 = vpop.f32.mrb[1].mxu1 }
 0x203   :  { %v260_v8 = vmax.f32 %v257_v6, 0.0 }
 0x205   :  { %394 = vmatmul.mubr.msk.f32.vlgmr.msra.gmra.mrb[2].mxu0 %vm186_vm2, %v260_v8 }
 0x2d8   :  { %v366_v16 = vpop.f32.mrb[2].mxu0 }
 0x2d9   :  { %v367_v17 = vadd.f32 %v366_v16, %v290_v14  ;;  %v368_v18 = vpop.f32.mrb[3].mxu0 }
 0x2da   :  { %v369_v19 = vadd.f32 %v368_v18, %v294_v15 }
 0x2db   :  { %371 = vst [vmem:[#allocation10] sm:$0xff] %v367_v17 }
 0x2dc   :  { %372 = vst [vmem:[#allocation10 + $0x8] sm:$0xff] %v369_v19 }
 0x2dd   :  { %610 = shalt.err (!%p607_p8)
}
 0x2de   :  { %s611_s10 = scalar_lea.hbm %s765_s7, 256 }
 0x2df   :  { %p612_p9 = scmp.ne.s32.totalorder %s765_s7, %s611_s10  ;;  %p615_p10 = scmp.lt.u32.totalorder %s611_s10, %s765_s7 }
 0x2e1   :  { %p617_p11 = pnand %p615_p10, %p612_p9 }
 0x2e3   :  { %620 = shalt.err (!%p617_p11)
}
 0x2e4   :  { %382 = dma.vmem_to_hbm [thread:$0]  %s380_s8, 256, %s765_s7, [#allocation4]  }
 0x2e5   :  { %627 = dma.done.wait [#allocation4], 256  }
 0x2e6   :  { %628 = vsyncadd [#allocation4], 4294967040 }
 0x2e7   :  { %386 = vsyncpa [#allocation3], 1 }
 0x2e8   :  { %387 = vsyncpa [#allocation6], 1 }
 0x2e9   :  { %388 = vsyncpa [#allocation9], 1 }
 0x2ea   :  { %389 = vsyncpa [#allocation4], 1 }

</bundles_post_ra>
